<compile_context>
chip_gen: v6e
topology: v6e:2x2x1
jax: 0.10.0
libtpu: 0.0.40
codegen_flags: <defaults>
</compile_context>

<pallas_src>
import math

import jax
import jax.numpy as jnp
from jax.experimental import pallas as pl
from jax.experimental.pallas import tpu as pltpu


_VMEM_LIMIT = 32 * 1024 * 1024  # explicit budget; safe on v5e/v6e/v7x


def _round_up(x, m):
    return ((x + m - 1) // m) * m


def _choose_tm(mp):
    """mp is a multiple of 16; prefer >=2 tiles so both v7x TensorCores get work."""
    for tm in (512, 256, 128, 64, 32, 16):
        if mp % tm == 0 and mp // tm >= 2:
            return tm
    return mp


# ----------------------------------------------------------------------------
# Pallas kernels
# ----------------------------------------------------------------------------
def _make_mm_kernel(apply_relu):
    """out = act(A @ W + b); W/b fully resident (no K/N grid), grid = M tiles."""

    def kernel(a_ref, w_ref, b_ref, o_ref):
        r = (
            jnp.dot(a_ref[...], w_ref[...], preferred_element_type=jnp.float32)
            + b_ref[...]
        )
        if apply_relu:
            r = jnp.maximum(r, 0.0)
        o_ref[...] = r.astype(o_ref.dtype)

    return kernel


def matmul_bias_act(a, w, b, relu, out_dtype=jnp.bfloat16):
    """a: (M, K) bf16, w: (K, N) bf16 (pre-cast), b: (N,) f32 -> (M, N)."""
    M, K = a.shape
    N = w.shape[1]
    a = a.astype(jnp.bfloat16)
    Mp = _round_up(M, 16)
    if Mp != M:  # only tiny late layers (M = B*H*W < 16) pay this pad
        a = jnp.pad(a, ((0, Mp - M), (0, 0)))
    tm = _choose_tm(Mp)

    out = pl.pallas_call(
        _make_mm_kernel(relu),
        out_shape=jax.ShapeDtypeStruct((Mp, N), out_dtype),
        grid=(Mp // tm,),
        in_specs=[
            pl.BlockSpec((tm, K), lambda i: (i, 0)),
            pl.BlockSpec((K, N), lambda i: (0, 0)),
            pl.BlockSpec((1, N), lambda i: (0, 0)),
        ],
        out_specs=pl.BlockSpec((tm, N), lambda i: (i, 0)),
        compiler_params=pltpu.CompilerParams(
            dimension_semantics=("parallel",),
            vmem_limit_bytes=_VMEM_LIMIT,
        ),
    )(a, w, b.reshape(1, N))
    return out[:M] if Mp != M else out


def _make_conv_kernel(k, Wp, Ho, Wo, apply_relu):
    """Fused stride-1 KxK conv: k*k shifted row-slab matmuls, f32 accumulation.

    The input block is the padded image flattened to rows of width Wp, so every
    kernel tap (di, dj) is a *contiguous* row range starting at di*Wp+dj.  The
    accumulator keeps Wp columns per output row; the (Wp - Wo) wrap-around
    garbage columns are sliced off in-kernel before the store.
    """
    Lrow = Ho * Wp

    def kernel(x_ref, w_ref, b_ref, o_ref):
        cout = o_ref.shape[-1]
        acc = None
        for di in range(k):
            for dj in range(k):
                off = di * Wp + dj
                slab = x_ref[0, off : off + Lrow, :]  # (Ho*Wp, Cin) bf16
                d = jnp.dot(
                    slab, w_ref[di * k + dj], preferred_element_type=jnp.float32
                )
                acc = d if acc is None else acc + d
        r = acc + b_ref[...]
        if apply_relu:
            r = jnp.maximum(r, 0.0)
        r = r.astype(o_ref.dtype).reshape(Ho, Wp, cout)[:, :Wo, :]
        o_ref[0] = r

    return kernel


def conv2d_fused(x, w, b, k, pad, relu=True, out_dtype=jnp.bfloat16):
    """Stride-1 KxK conv + folded-BN bias + ReLU without HBM im2col patches.

    x: (B, H, W, Cin) bf16; w: (k*k, Cin, Cout) bf16; b: (Cout,) f32.
    Grid iterates over the batch; weights/bias stay resident across grid steps.
    """
    B, H, W, Cin = x.shape
    Cout = w.shape[-1]
    Hp, Wp = H + 2 * pad, W + 2 * pad
    Ho, Wo = Hp - k + 1, Wp - k + 1

    xf = jnp.pad(x.astype(jnp.bfloat16), ((0, 0), (pad, pad), (pad, pad), (0, 0)))
    xf = xf.reshape(B, Hp * Wp, Cin)
    if k > 1:
        xf = jnp.pad(xf, ((0, 0), (0, k - 1), (0, 0)))  # tail rows for last taps
    L = xf.shape[1]

    return pl.pallas_call(
        _make_conv_kernel(k, Wp, Ho, Wo, relu),
        out_shape=jax.ShapeDtypeStruct((B, Ho, Wo, Cout), out_dtype),
        grid=(B,),
        in_specs=[
            pl.BlockSpec((1, L, Cin), lambda i: (i, 0, 0)),
            pl.BlockSpec((k * k, Cin, Cout), lambda i: (0, 0, 0)),
            pl.BlockSpec((1, Cout), lambda i: (0, 0)),
        ],
        out_specs=pl.BlockSpec((1, Ho, Wo, Cout), lambda i: (i, 0, 0, 0)),
        compiler_params=pltpu.CompilerParams(
            dimension_semantics=("parallel",),
            vmem_limit_bytes=_VMEM_LIMIT,
        ),
    )(xf, w, b.reshape(1, Cout))


def _make_head_kernel(normalize):
    """Fused: global avg-pool over spatial, fc matmul (bf16 x bf16 -> f32) + bias,
    optional L2 normalize."""

    def kernel(f_ref, w_ref, b_ref, o_ref):
        pooled = jnp.mean(f_ref[...].astype(jnp.float32), axis=1)  # (Bp, C)
        out = (
            jnp.dot(
                pooled.astype(jnp.bfloat16),
                w_ref[...],
                preferred_element_type=jnp.float32,
            )
            + b_ref[...]
        )
        if normalize:
            nrm = jnp.sqrt(jnp.sum(out * out, axis=-1, keepdims=True))
            out = out / jnp.maximum(nrm, 1e-12)  # F.normalize(dim=-1) semantics
        o_ref[...] = out.astype(o_ref.dtype)

    return kernel


def head_pool_fc(feats, w, b, embed_dim, normalize):
    """feats: (B, S, C) bf16; w: (C, Ep) bf16 pre-padded; b: (Ep,) f32 pre-padded.

    Padded weight/bias columns are zero, so the L2 norm over the padded axis is
    exact; padded batch rows are sliced off before returning.
    """
    B, S, C = feats.shape
    Ep = w.shape[1]
    Bp = max(8, _round_up(B, 8))
    f_p = jnp.pad(feats, ((0, Bp - B), (0, 0), (0, 0)))

    out = pl.pallas_call(
        _make_head_kernel(normalize),
        out_shape=jax.ShapeDtypeStruct((Bp, Ep), jnp.float32),
        grid=(1,),
        in_specs=[
            pl.BlockSpec((Bp, S, C), lambda i: (0, 0, 0)),
            pl.BlockSpec((C, Ep), lambda i: (0, 0)),
            pl.BlockSpec((1, Ep), lambda i: (0, 0)),
        ],
        out_specs=pl.BlockSpec((Bp, Ep), lambda i: (0, 0)),
        compiler_params=pltpu.CompilerParams(vmem_limit_bytes=_VMEM_LIMIT),
    )(f_p, w, b.reshape(1, Ep))
    return out[:B, :embed_dim]


# ----------------------------------------------------------------------------
# JAX glue: im2col (conv1 only), max-pool (ceil_mode), layer application
# ----------------------------------------------------------------------------
def im2col(x, k, stride, pad):
    """x: (B, H, W, C) NHWC -> ((B*Ho*Wo, k*k*C), Ho, Wo); col order (kh, kw, C)."""
    B, H, W, C = x.shape
    xp = jnp.pad(x, ((0, 0), (pad, pad), (pad, pad), (0, 0)))
    Ho = (H + 2 * pad - k) // stride + 1
    Wo = (W + 2 * pad - k) // stride + 1
    cols = []
    for di in range(k):
        for dj in range(k):
            sl = xp[:, di : di + stride * Ho : stride, dj : dj + stride * Wo : stride, :]
            cols.append(sl)
    patches = jnp.concatenate(cols, axis=-1)
    return patches.reshape(B * Ho * Wo, k * k * C), Ho, Wo


def maxpool2d(x, k, s, pad):
    """PyTorch MaxPool2d with ceil_mode=True, NHWC.  (cheap glue op)"""
    B, H, W, C = x.shape

    def out_dim(d):
        o = math.ceil((d + 2 * pad - k) / s) + 1
        if (o - 1) * s >= d + pad:
            o -= 1
        return o

    Ho, Wo = out_dim(H), out_dim(W)
    ph = max(0, (Ho - 1) * s + k - H - pad)
    pw = max(0, (Wo - 1) * s + k - W - pad)
    init = jnp.array(-jnp.inf, dtype=x.dtype)
    return jax.lax.reduce_window(
        x,
        init,
        jax.lax.max,
        window_dimensions=(1, k, k, 1),
        window_strides=(1, s, s, 1),
        padding=((0, 0), (pad, ph), (pad, pw), (0, 0)),
    )


def basic_conv_apply(p, x, stride=1, pad=0):
    """BasicConv2d (conv + folded BN + ReLU) via fused-conv or matmul kernels."""
    k = p["k"]
    B = x.shape[0]
    if k == 1:
        H, W = x.shape[1], x.shape[2]
        y = matmul_bias_act(x.reshape(B * H * W, -1), p["W"], p["b"], relu=True)
        return y.reshape(B, H, W, -1)
    if stride == 1:
        return conv2d_fused(x, p["W"], p["b"], k=k, pad=pad, relu=True)
    # TODO(synk): conv1 (7x7 stride 2) still uses an XLA im2col (49x inflation on a
    # 3-channel input only); a strided-slab Pallas kernel would remove it entirely.
    a, Ho, Wo = im2col(x, k, stride, pad)
    w2 = p["W"].reshape(k * k * x.shape[3], -1)  # (k*k, Cin, Cout) -> (k*k*Cin, Cout)
    y = matmul_bias_act(a, w2, p["b"], relu=True)
    return y.reshape(B, Ho, Wo, -1)


def inception_apply(p, x):
    B, H, W, Cin = x.shape
    # --- fused 1x1 branches (b1 / 3x3-reduce / 5x5-reduce): one wide matmul ---
    f = p["fused1x1"]
    y = matmul_bias_act(x.reshape(B * H * W, Cin), f["W"], f["b"], relu=True)
    c1, c3r, c5r = f["splits"]
    b1 = y[:, :c1].reshape(B, H, W, c1)
    x2 = y[:, c1 : c1 + c3r].reshape(B, H, W, c3r)
    x3 = y[:, c1 + c3r :].reshape(B, H, W, c5r)
    # --- 3x3 branches: fused conv kernels (no im2col) ---
    b2 = conv2d_fused(x2, p["b2b"]["W"], p["b2b"]["b"], k=3, pad=1)
    b3 = conv2d_fused(x3, p["b3b"]["W"], p["b3b"]["b"], k=3, pad=1)
    # TODO(synk): fuse this 3x3/1 max-pool into the b4 1x1 matmul kernel
    xp = maxpool2d(x, 3, 1, 1)
    b4 = matmul_bias_act(
        xp.reshape(B * H * W, Cin), p["b4"]["W"], p["b4"]["b"], relu=True
    ).reshape(B, H, W, -1)
    # TODO(synk): write branch outputs at channel offsets of one buffer instead of concat
    return jnp.concatenate([b1, b2, b3, b4], axis=-1)


# ----------------------------------------------------------------------------
# Deterministic synthetic parameters (shapes of torchvision GoogLeNet)
# ----------------------------------------------------------------------------
INCEPTION_CFG = {
    "3a": (192, 64, 96, 128, 16, 32, 32),
    "3b": (256, 128, 128, 192, 32, 96, 64),
    "4a": (480, 192, 96, 208, 16, 48, 64),
    "4b": (512, 160, 112, 224, 24, 64, 64),
    "4c": (512, 128, 128, 256, 24, 64, 64),
    "4d": (512, 112, 144, 288, 32, 64, 64),
    "4e": (528, 256, 160, 320, 32, 128, 128),
    "5a": (832, 256, 160, 320, 32, 128, 128),
    "5b": (832, 384, 192, 384, 48, 128, 128),
}


def make_bconv(key, cin, cout, k):
    kw_, kg, kb, km, kv = jax.random.split(key, 5)
    w = jax.random.normal(kw_, (k, k, cin, cout), jnp.float32) * math.sqrt(
        2.0 / (k * k * cin)
    )
    gamma = 1.0 + 0.1 * jax.random.normal(kg, (cout,), jnp.float32)
    beta = 0.1 * jax.random.normal(kb, (cout,), jnp.float32)
    mean = 0.1 * jax.random.normal(km, (cout,), jnp.float32)
    var = jnp.abs(1.0 + 0.1 * jax.random.normal(kv, (cout,), jnp.float32))
    scale = gamma / jnp.sqrt(var + 1e-3)  # fold eval-mode BN into the conv
    wf = (w * scale).astype(jnp.bfloat16)  # bf16 MXU operand, stored once at init
    W = wf.reshape(cin, cout) if k == 1 else wf.reshape(k * k, cin, cout)
    return {"W": W, "b": (beta - mean * scale).astype(jnp.float32), "k": k}


def make_inception(key, cin, c1, c3r, c3, c5r, c5, cp):
    ks = jax.random.split(key, 6)
    b1 = make_bconv(ks[0], cin, c1, 1)
    b2a = make_bconv(ks[1], cin, c3r, 1)
    b3a = make_bconv(ks[2], cin, c5r, 1)
    # pre-fuse the three 1x1 branches that read the same input
    fused = {
        "W": jnp.concatenate([b1["W"], b2a["W"], b3a["W"]], axis=1),
        "b": jnp.concatenate([b1["b"], b2a["b"], b3a["b"]], axis=0),
        "splits": (c1, c3r, c5r),
    }
    return {
        "fused1x1": fused,
        "b2b": make_bconv(ks[3], c3r, c3, 3),
        "b3b": make_bconv(ks[4], c5r, c5, 3),  # torchvision uses 3x3 here
        "b4": make_bconv(ks[5], cin, cp, 1),
    }


def init_params(key, embed_dim):
    params = {}
    k0, k1, k2, kfc, kinc = jax.random.split(key, 5)
    params["conv1"] = make_bconv(k0, 3, 64, 7)
    params["conv2"] = make_bconv(k1, 64, 64, 1)
    params["conv3"] = make_bconv(k2, 64, 192, 3)
    for name, cfg in INCEPTION_CFG.items():
        kinc, sub = jax.random.split(kinc)
        params[name] = make_inception(sub, *cfg)
    kw_, kb = jax.random.split(kfc)
    fc_w = jax.random.normal(kw_, (1024, embed_dim), jnp.float32) / math.sqrt(1024.0)
    fc_b = 0.01 * jax.random.normal(kb, (embed_dim,), jnp.float32)
    # pre-pad the head to a lane-dense 128-wide output and pre-cast to bf16
    Ep = _round_up(embed_dim, 128)
    params["fc_W"] = jnp.pad(fc_w, ((0, 0), (0, Ep - embed_dim))).astype(jnp.bfloat16)
    params["fc_b"] = jnp.pad(fc_b, (0, Ep - embed_dim)).astype(jnp.float32)
    params["embed_dim"] = embed_dim
    return params


# ----------------------------------------------------------------------------
# Full forward (Network.forward semantics, eval mode)
# ----------------------------------------------------------------------------
def network_forward(params, x_nchw, arch="googlenet_normalize"):
    x = x_nchw.astype(jnp.float32)
    # transform_input=True (pretrained googlenet): one fused scale+shift pass
    scale = jnp.array([0.229 / 0.5, 0.224 / 0.5, 0.225 / 0.5], jnp.float32)
    shift = jnp.array(
        [(0.485 - 0.5) / 0.5, (0.456 - 0.5) / 0.5, (0.406 - 0.5) / 0.5], jnp.float32
    )
    x = x * scale.reshape(1, 3, 1, 1) + shift.reshape(1, 3, 1, 1)
    x = jnp.transpose(x, (0, 2, 3, 1)).astype(jnp.bfloat16)  # NCHW -> NHWC, bf16

    x = basic_conv_apply(params["conv1"], x, stride=2, pad=3)
    x = maxpool2d(x, 3, 2, 0)
    x = basic_conv_apply(params["conv2"], x)
    x = basic_conv_apply(params["conv3"], x, pad=1)
    x = maxpool2d(x, 3, 2, 0)

    x = inception_apply(params["3a"], x)
    x = inception_apply(params["3b"], x)
    x = maxpool2d(x, 3, 2, 0)
    for name in ("4a", "4b", "4c", "4d", "4e"):
        x = inception_apply(params[name], x)
    x = maxpool2d(x, 2, 2, 0)
    x = inception_apply(params["5a"], x)
    x = inception_apply(params["5b"], x)

    # Aux classifiers are only evaluated in training mode; Dropout(0.2) is identity in eval.
    B, H, W, C = x.shape
    feats = x.reshape(B, H * W, C)
    return head_pool_fc(
        feats,
        params["fc_W"],
        params["fc_b"],
        params["embed_dim"],
        normalize=("normalize" in arch),
    )


# ----------------------------------------------------------------------------
if __name__ == "__main__":
    key = jax.random.PRNGKey(0)
    pkey, xkey = jax.random.split(key)

    embed_dim = 64
    params = init_params(pkey, embed_dim)

    # Small image consistent with a GoogLeNet-style 3-channel input.
    x = jax.random.normal(xkey, (2, 3, 32, 32), jnp.float32)

    out = network_forward(params, x, arch="googlenet_normalize")
    out = jax.block_until_ready(out)

    assert out.shape == (2, embed_dim)
    assert bool(jnp.all(jnp.isfinite(out)))
    print("KERNEL_OK")
</pallas_src>

<mosaic_0001>
module attributes {stable_mosaic.version = 11 : i64} {
  func.func @kernel(%arg0: i32, %arg1: memref<256x147xbf16, #tpu.memory_space<vmem>>, %arg2: memref<147x64xbf16, #tpu.memory_space<vmem>>, %arg3: memref<1x64xf32, #tpu.memory_space<vmem>>, %arg4: memref<256x64xbf16, #tpu.memory_space<vmem>>) attributes {dimension_semantics = [#tpu.dimension_semantics<parallel>], iteration_bounds = array<i64: 2>, scalar_prefetch = 0 : i64, scratch_operands = 0 : i64, tpu.core_type = #tpu.core_type<tc>, window_params = [{transform_indices = @transform_0, window_bounds = array<i64: 256, 147>}, {pipeline_mode = #tpu.pipeline_mode<synchronous>, transform_indices = @transform_1, window_bounds = array<i64: 147, 64>}, {pipeline_mode = #tpu.pipeline_mode<synchronous>, transform_indices = @transform_2, window_bounds = array<i64: 1, 64>}, {transform_indices = @transform_3, window_bounds = array<i64: 256, 64>}]} {
    %c0 = arith.constant 0 : index
    %c0_0 = arith.constant 0 : index
    %0 = vector.load %arg1[%c0, %c0_0] : memref<256x147xbf16, #tpu.memory_space<vmem>>, vector<256x147xbf16>
    %c0_1 = arith.constant 0 : index
    %c0_2 = arith.constant 0 : index
    %1 = vector.load %arg2[%c0_1, %c0_2] : memref<147x64xbf16, #tpu.memory_space<vmem>>, vector<147x64xbf16>
    %cst = arith.constant dense<0.000000e+00> : vector<256x64xf32>
    %2 = tpu.matmul %0, %1, %cst {dimension_numbers = #tpu.dot_dimension_numbers<[1], [0], [0], [1], [0, 0, 1, 1], [], []>} : vector<256x147xbf16>, vector<147x64xbf16>, vector<256x64xf32> -> vector<256x64xf32>
    %c0_3 = arith.constant 0 : index
    %c0_4 = arith.constant 0 : index
    %3 = vector.load %arg3[%c0_3, %c0_4] : memref<1x64xf32, #tpu.memory_space<vmem>>, vector<1x64xf32>
    %4 = vector.broadcast %3 : vector<1x64xf32> to vector<256x64xf32>
    %5 = arith.addf %2, %4 : vector<256x64xf32>
    %cst_5 = arith.constant 0.000000e+00 : f32
    %6 = vector.broadcast %cst_5 : f32 to vector<256x64xf32>
    %7 = arith.maximumf %5, %6 : vector<256x64xf32>
    %8 = arith.truncf %7 : vector<256x64xf32> to vector<256x64xbf16>
    %c0_6 = arith.constant 0 : index
    %c0_7 = arith.constant 0 : index
    %9 = vector.load %arg4[%c0_6, %c0_7] : memref<256x64xbf16, #tpu.memory_space<vmem>>, vector<256x64xbf16>
    tpu.vector_store %arg4[%c0_6, %c0_7], %8 {strides = array<i32>} : memref<256x64xbf16, #tpu.memory_space<vmem>>, vector<256x64xbf16>,
    return
  }
  func.func @transform_0(%arg0: i32) -> (i32, i32) {
    %c0_i32 = arith.constant 0 : i32
    %c0_i32_0 = arith.constant 0 : i32
    return %arg0, %c0_i32 : i32, i32
  }
  func.func @transform_1(%arg0: i32) -> (i32, i32) {
    %c0_i32 = arith.constant 0 : i32
    %c0_i32_0 = arith.constant 0 : i32
    %c0_i32_1 = arith.constant 0 : i32
    return %c0_i32, %c0_i32_0 : i32, i32
  }
  func.func @transform_2(%arg0: i32) -> (i32, i32) {
    %c0_i32 = arith.constant 0 : i32
    %c0_i32_0 = arith.constant 0 : i32
    %c0_i32_1 = arith.constant 0 : i32
    return %c0_i32, %c0_i32_0 : i32, i32
  }
  func.func @transform_3(%arg0: i32) -> (i32, i32) {
    %c0_i32 = arith.constant 0 : i32
    %c0_i32_0 = arith.constant 0 : i32
    return %arg0, %c0_i32 : i32, i32
  }
}

</mosaic_0001>

<bundles_post_ra>
// kernel: tpu_custom_call.1
= control target key start
LH: loop header
LB: loop body
LE: loop exit
PB: predicated region body
PF: predicated region fallthrough
CT: control target
= control target key end

     0   :  { %s1157_s12 = smov 0   ;;  %s1361_s0 = inlined_call_operand.vmem [shape: bf16[512,147], index: 0, kind: input, shape index: {}]   ;;  %s1362_s1 = inlined_call_operand.vmem [shape: bf16[147,64], index: 1, kind: input, shape index: {}]   ;;  %s1363_s2 = inlined_call_operand.vmem [shape: f32[1,64], index: 2, kind: input, shape index: {}]   ;;  %s1364_s3 = inlined_call_operand.vmem [shape: bf16[512,64], index: 3, kind: output, shape index: {}]  }
   0x1 LB: > { %s903_s13 = sadd.s32 4294967295, %s1133_s12   ;;  %p907_p0 = scmp.ge.s32.totalorder %s1133_s12, 1  ;;  %s1133_s12 = sphi %s1157_s12, %s13_s12  }
   0x2   : > { %p139_p1 = scmp.lt.s32.totalorder %s1133_s12, 3 }
   0x4   : > { %p140_p2 = pnand %p907_p0, %p139_p1 }
   0x5   : > { %s908_s20 = sshll.u32 (!%p140_p2), %s903_s13, 5 }
   0x6   : > { %143 = sbr.rel (%p140_p2) target bundleno = 312 (0x138), region = 32  ;;  %p165_p3 = scmp.lt.s32.totalorder (!%p140_p2), %s908_s20, 63 }
   0xb   : > { %v1069_v0 = vld [vmem:[%s1362_s1 + $0x38] sm:$0xff]   ;;  %v1135_v1 = vmov 0   ;;  %v1070_v2 = vld [vmem:[%s1362_s1 + $0x30] sm:$0xff]   ;;  %v1071_v3 = vld [vmem:[%s1362_s1 + $0x28] sm:$0xff]   ;;  %s1366_s20 = smov (!%p165_p3, %s908_s20), 63  ;;  %vm437_vm0 = vcmask 154624  }
   0xc   : > { %493 = vmatprep.subr.bf16.mxu0 %v1135_v1  ;;  %1039 = vmatprep.subr.bf16.mxu1 %v1135_v1  ;;  %v1072_v4 = vld [vmem:[%s1362_s1 + $0x20] sm:$0xff]   ;;  %s1006_s23 = sshll.u32 %s1366_s20, 3  ;;  %v1073_v5 = vld [vmem:[%s1362_s1 + $0x18] sm:$0xff]   ;;  %v1074_v8 = vld [vmem:[%s1362_s1 + $0x10] sm:$0xff]   ;;  %vm486_vm1 = vcmask 1040384   ;;  %vm487_vm2 = vcmask 1041408  }
   0xd   : > { %494 = vmatpush1.bf16.msra.mxu0 %v1069_v0  ;;  %1049 = vmatpush1.bf16.msra.mxu1 %v1069_v0  ;;  %s1183_s26 = scalar_lea.vmem %s1361_s0, %s1006_s23  ;;  %v1075_v9 = vld [vmem:[%s1362_s1 + $0x8] sm:$0xff]   ;;  %v1136_v10 = vmov 65535   ;;  %v1076_v12 = vld [vmem:[%s1362_s1] sm:$0xff]   ;;  %s912_s15 = sshll.u32 %s1366_s20, 2  ;;  %vm814_vm3 = vcmask 519168  }
   0xe   : > { %495 = vmatprep.subr.bf16.mxu0 %v1135_v1  ;;  %1040 = vmatprep.subr.bf16.mxu1 %v1135_v1  ;;  %v1081_v6 = vld [vmem:[%s1183_s26 + $0x4] ss:$8 sps:$4 sm:$0xff]   ;;  %v488_v11 = vsel %vm486_vm1, 4294967295, %v1136_v10  ;;  %v1077_v13 = vld [vmem:[%s1362_s1 + $0x48] ss:$0 sps:$4 sm:$0x33]   ;;  %s1262_s18 = scalar_lea.vmem %s1364_s3, %s912_s15 }
   0xf   : > { %v1084_v7 = vld [vmem:[%s1183_s26 + $0x84] ss:$8 sps:$4 sm:$0xff]   ;;  %956 = vmatprep.mubr.msk.bf16.mxu0 %vm437_vm0, %v1081_v6  ;;  %v489_v14 = vsel %vm487_vm2, %v488_v11, 0  ;;  %v1079_v17 = vld [vmem:[%s1183_s26] ss:$8 sps:$4 sm:$0xff]  }
  0x10   : > { %964 = vmatprep.mubr.msk.bf16.mxu1 %vm437_vm0, %v1084_v7  ;;  %v491_v15 = vand.u32 %v1077_v13, %v489_v14  ;;  %v1078_v16 = vld [vmem:[%s1362_s1 + $0x40] sm:$0xff]   ;;  %v1085_v19 = vld [vmem:[%s1183_s26 + $0x14] ss:$8 sps:$4 sm:$0xff]   ;;  %v1089_v21 = vld [vmem:[%s1183_s26 + $0x10] ss:$8 sps:$4 sm:$0xff]  }
  0x11   : > { %496 = vmatpush1.bf16.msra.mxu0 %v1070_v2  ;;  %1050 = vmatpush1.bf16.msra.mxu1 %v1070_v2  ;;  %v1082_v18 = vld [vmem:[%s1183_s26 + $0x80] ss:$8 sps:$4 sm:$0xff]   ;;  %v1087_v20 = vld [vmem:[%s1183_s26 + $0x94] ss:$8 sps:$4 sm:$0xff]   ;;  %v1090_v22 = vld [vmem:[%s1183_s26 + $0x90] ss:$8 sps:$4 sm:$0xff]  }
  0x12   : > { %497 = vmatprep.subr.bf16.mxu0 %v1135_v1  ;;  %1041 = vmatprep.subr.bf16.mxu1 %v1135_v1  ;;  %v1091_v23 = vld [vmem:[%s1183_s26 + $0x24] ss:$8 sps:$4 sm:$0xff]   ;;  %v1095_v25 = vld [vmem:[%s1183_s26 + $0x20] ss:$8 sps:$4 sm:$0xff]   ;;  %v1097_v27 = vld [vmem:[%s1183_s26 + $0x34] ss:$8 sps:$4 sm:$0xff]  }
  0x13   : > { %v1093_v24 = vld [vmem:[%s1183_s26 + $0xa4] ss:$8 sps:$4 sm:$0xff]   ;;  %v1096_v26 = vld [vmem:[%s1183_s26 + $0xa0] ss:$8 sps:$4 sm:$0xff]   ;;  %v1099_v28 = vld [vmem:[%s1183_s26 + $0xb4] ss:$8 sps:$4 sm:$0xff]  }
  0x14   : > { %v1101_v29 = vld [vmem:[%s1183_s26 + $0x30] ss:$8 sps:$4 sm:$0xff]   ;;  %v1103_v31 = vld [vmem:[%s1183_s26 + $0x44] ss:$8 sps:$4 sm:$0xff]   ;;  %v1107_v33 = vld [vmem:[%s1183_s26 + $0x40] ss:$8 sps:$4 sm:$0xff]  }
  0x15   : > { %498 = vmatpush1.bf16.msra.mxu0 %v1071_v3  ;;  %1051 = vmatpush1.bf16.msra.mxu1 %v1071_v3  ;;  %v1102_v30 = vld [vmem:[%s1183_s26 + $0xb0] ss:$8 sps:$4 sm:$0xff]   ;;  %v1105_v32 = vld [vmem:[%s1183_s26 + $0xc4] ss:$8 sps:$4 sm:$0xff]   ;;  %v1108_v34 = vld [vmem:[%s1183_s26 + $0xc0] ss:$8 sps:$4 sm:$0xff]  }
  0x16   : > { %499 = vmatprep.subr.bf16.mxu0 %v1135_v1  ;;  %1042 = vmatprep.subr.bf16.mxu1 %v1135_v1  ;;  %v1109_v35 = vld [vmem:[%s1183_s26 + $0x54] ss:$8 sps:$4 sm:$0xff]   ;;  %v1113_v37 = vld [vmem:[%s1183_s26 + $0x50] ss:$8 sps:$4 sm:$0xff]   ;;  %v1115_v39 = vld [vmem:[%s1183_s26 + $0x64] ss:$8 sps:$4 sm:$0xff]  }
  0x17   : > { %v1111_v36 = vld [vmem:[%s1183_s26 + $0xd4] ss:$8 sps:$4 sm:$0xff]   ;;  %v1114_v38 = vld [vmem:[%s1183_s26 + $0xd0] ss:$8 sps:$4 sm:$0xff]   ;;  %v1117_v40 = vld [vmem:[%s1183_s26 + $0xe4] ss:$8 sps:$4 sm:$0xff]  }
  0x18   : > { %v1119_v41 = vld [vmem:[%s1183_s26 + $0x60] ss:$8 sps:$4 sm:$0xff]   ;;  %v1121_v43 = vld [vmem:[%s1183_s26 + $0x74] ss:$8 sps:$4 sm:$0xff]   ;;  %v1125_v45 = vld [vmem:[%s1183_s26 + $0x70] ss:$8 sps:$4 sm:$0xff]  }
  0x19   : > { %500 = vmatpush1.bf16.msra.mxu0 %v1072_v4  ;;  %1052 = vmatpush1.bf16.msra.mxu1 %v1072_v4  ;;  %v1120_v42 = vld [vmem:[%s1183_s26 + $0xe0] ss:$8 sps:$4 sm:$0xff]   ;;  %v1123_v44 = vld [vmem:[%s1183_s26 + $0xf4] ss:$8 sps:$4 sm:$0xff]   ;;  %v1126_v46 = vld [vmem:[%s1183_s26 + $0xf0] ss:$8 sps:$4 sm:$0xff]  }
  0x1a   : > { %501 = vmatprep.subr.bf16.mxu0 %v1135_v1  ;;  %1043 = vmatprep.subr.bf16.mxu1 %v1135_v1  ;;  %v1254_v47 = vld [vmem:[%s1363_s2] ss:$0 sm:$0xff] }
  0x1d   : > { %502 = vmatpush1.bf16.msra.mxu0 %v1073_v5  ;;  %1053 = vmatpush1.bf16.msra.mxu1 %v1073_v5 }
  0x1e   : > { %503 = vmatprep.subr.bf16.mxu0 %v1135_v1  ;;  %1044 = vmatprep.subr.bf16.mxu1 %v1135_v1 }
  0x21   : > { %504 = vmatpush1.bf16.msra.mxu0 %v1074_v8  ;;  %1054 = vmatpush1.bf16.msra.mxu1 %v1074_v8 }
  0x22   : > { %505 = vmatprep.subr.bf16.mxu0 %v1135_v1  ;;  %1045 = vmatprep.subr.bf16.mxu1 %v1135_v1 }
  0x25   : > { %506 = vmatpush1.bf16.msra.mxu0 %v1075_v9  ;;  %1055 = vmatpush1.bf16.msra.mxu1 %v1075_v9 }
  0x26   : > { %507 = vmatprep.subr.bf16.mxu0 %v1135_v1  ;;  %1046 = vmatprep.subr.bf16.mxu1 %v1135_v1 }
  0x29   : > { %508 = vmatpush1.bf16.msra.mxu0 %v1076_v12  ;;  %1056 = vmatpush1.bf16.msra.mxu1 %v1076_v12 }
  0x2a   : > { %521 = vmatprep.subr.bf16.mxu0 %v1135_v1  ;;  %1047 = vmatprep.subr.bf16.mxu1 %v1135_v1 }
  0x2d   : > { %522 = vmatpush2.bf16.msra.mxu0 %v491_v15  ;;  %1057 = vmatpush2.bf16.msra.mxu1 %v491_v15 }
  0x2e   : > { %523 = vmatprep.subr.bf16.mxu0 %v1135_v1  ;;  %1048 = vmatprep.subr.bf16.mxu1 %v1135_v1 }
  0x31   : > { %524 = vmatpush2.bf16.msra.mxu0 %v1078_v16  ;;  %1058 = vmatpush2.bf16.msra.mxu1 %v1078_v16 }
  0x34   : > { %526 = vmatmul.mubr.bf16.vlgmr.msra.gmra.mxu0 %v1079_v17  ;;  %590 = vmatmul.mubr.bf16.vlgmr.msra.gmra.mxu1 %v1082_v18 }
  0x35   : > { %957 = vmatprep.mubr.msk.bf16.mxu0 %vm437_vm0, %v1085_v19  ;;  %965 = vmatprep.mubr.msk.bf16.mxu1 %vm437_vm0, %v1087_v20 }
  0x3c   : > { %534 = vmatmul.mubr.bf16.gmra.mxu0 %v1089_v21  ;;  %598 = vmatmul.mubr.bf16.gmra.mxu1 %v1090_v22 }
  0x3d   : > { %958 = vmatprep.mubr.msk.bf16.mxu0 %vm437_vm0, %v1091_v23  ;;  %966 = vmatprep.mubr.msk.bf16.mxu1 %vm437_vm0, %v1093_v24 }
  0x44   : > { %542 = vmatmul.mubr.bf16.gmra.mxu0 %v1095_v25  ;;  %606 = vmatmul.mubr.bf16.gmra.mxu1 %v1096_v26 }
  0x45   : > { %959 = vmatprep.mubr.msk.bf16.mxu0 %vm437_vm0, %v1097_v27  ;;  %967 = vmatprep.mubr.msk.bf16.mxu1 %vm437_vm0, %v1099_v28 }
  0x4c   : > { %550 = vmatmul.mubr.bf16.gmra.mxu0 %v1101_v29  ;;  %614 = vmatmul.mubr.bf16.gmra.mxu1 %v1102_v30 }
  0x4d   : > { %960 = vmatprep.mubr.msk.bf16.mxu0 %vm437_vm0, %v1103_v31  ;;  %968 = vmatprep.mubr.msk.bf16.mxu1 %vm437_vm0, %v1105_v32 }
  0x54   : > { %558 = vmatmul.mubr.bf16.gmra.mxu0 %v1107_v33  ;;  %622 = vmatmul.mubr.bf16.gmra.mxu1 %v1108_v34 }
  0x55   : > { %961 = vmatprep.mubr.msk.bf16.mxu0 %vm437_vm0, %v1109_v35  ;;  %969 = vmatprep.mubr.msk.bf16.mxu1 %vm437_vm0, %v1111_v36 }
  0x5c   : > { %566 = vmatmul.mubr.bf16.gmra.mxu0 %v1113_v37  ;;  %630 = vmatmul.mubr.bf16.gmra.mxu1 %v1114_v38 }
  0x5d   : > { %962 = vmatprep.mubr.msk.bf16.mxu0 %vm437_vm0, %v1115_v39  ;;  %970 = vmatprep.mubr.msk.bf16.mxu1 %vm437_vm0, %v1117_v40 }
  0x64   : > { %574 = vmatmul.mubr.bf16.gmra.mxu0 %v1119_v41  ;;  %638 = vmatmul.mubr.bf16.gmra.mxu1 %v1120_v42 }
  0x65   : > { %963 = vmatprep.mubr.msk.bf16.mxu0 %vm437_vm0, %v1121_v43  ;;  %971 = vmatprep.mubr.msk.bf16.mxu1 %vm437_vm0, %v1123_v44 }
  0x6c   : > { %582 = vmatmul.mubr.bf16.gmra.mxu0 %v1125_v45  ;;  %646 = vmatmul.mubr.bf16.gmra.mxu1 %v1126_v46 }
  0xf4   : > { %v527_v48 = vpop.f32.mrf.mxu0  ;;  %v591_v49 = vpop.f32.mrf.mxu1 }
  0xf5   : > { %v528_v50 = vadd.f32 %v1254_v47, %v527_v48  ;;  %v592_v51 = vadd.f32 %v1254_v47, %v591_v49 }
  0xf6   : > { %v529_v52 = vpop.f32.mrf.mxu0  ;;  %v593_v53 = vpop.f32.mrf.mxu1 }
  0xf7   : > { %v654_v54 = vmax.f32 %v528_v50, 0.0  ;;  %v670_v55 = vmax.f32 %v592_v51, 0.0 }
  0xf8   : > { %v530_v56 = vpop.f32.mrf.mxu0  ;;  %v594_v57 = vpop.f32.mrf.mxu1 }
  0xf9   : > { %v1007_v58 = vpack.c.bf16 %v654_v54, %v654_v54  ;;  %v1023_v59 = vpack.c.bf16 %v670_v55, %v670_v55  ;;  %v531_v60 = vadd.f32 %v1254_v47, %v530_v56  ;;  %v595_v61 = vadd.f32 %v1254_v47, %v594_v57 }
  0xfa   : > { %v532_v62 = vpop.f32.mrf.mxu0  ;;  %v596_v63 = vpop.f32.mrf.mxu1 }
  0xfb   : > { %815 = vst.msk [vmem:[%s1262_s18] sm:$0xf] %vm814_vm3, %v1007_v58  ;;  %831 = vst.msk [vmem:[%s1262_s18 + $0x40] sm:$0xf] %vm814_vm3, %v1023_v59  ;;  %v655_v0 = vmax.f32 %v531_v60, 0.0  ;;  %v671_v1 = vmax.f32 %v595_v61, 0.0 }
  0xfc   : > { %v535_v2 = vpop.f32.mrf.mxu0  ;;  %v599_v3 = vpop.f32.mrf.mxu1 }
  0xfd   : > { %v1008_v4 = vpack.c.bf16 %v655_v0, %v655_v0  ;;  %v1024_v5 = vpack.c.bf16 %v671_v1, %v671_v1  ;;  %v536_v6 = vadd.f32 %v1254_v47, %v535_v2  ;;  %v600_v7 = vadd.f32 %v1254_v47, %v599_v3 }
  0xfe   : > { %v537_v8 = vpop.f32.mrf.mxu0  ;;  %v601_v9 = vpop.f32.mrf.mxu1 }
  0xff   : > { %816 = vst.msk [vmem:[%s1262_s18 + $0x4] sm:$0xf] %vm814_vm3, %v1008_v4  ;;  %832 = vst.msk [vmem:[%s1262_s18 + $0x44] sm:$0xf] %vm814_vm3, %v1024_v5  ;;  %v656_v10 = vmax.f32 %v536_v6, 0.0  ;;  %v672_v11 = vmax.f32 %v600_v7, 0.0 }
 0x100   : > { %v538_v12 = vpop.f32.mrf.mxu0  ;;  %v602_v13 = vpop.f32.mrf.mxu1 }
 0x101   : > { %v1009_v14 = vpack.c.bf16 %v656_v10, %v656_v10  ;;  %v1025_v15 = vpack.c.bf16 %v672_v11, %v672_v11  ;;  %v539_v16 = vadd.f32 %v1254_v47, %v538_v12  ;;  %v603_v17 = vadd.f32 %v1254_v47, %v602_v13 }
 0x102   : > { %v540_v18 = vpop.f32.mrf.mxu0  ;;  %v604_v19 = vpop.f32.mrf.mxu1 }
 0x103   : > { %817 = vst.msk [vmem:[%s1262_s18 + $0x8] sm:$0xf] %vm814_vm3, %v1009_v14  ;;  %833 = vst.msk [vmem:[%s1262_s18 + $0x48] sm:$0xf] %vm814_vm3, %v1025_v15  ;;  %v657_v20 = vmax.f32 %v539_v16, 0.0  ;;  %v673_v21 = vmax.f32 %v603_v17, 0.0 }
 0x104   : > { %v543_v22 = vpop.f32.mrf.mxu0  ;;  %v607_v23 = vpop.f32.mrf.mxu1 }
 0x105   : > { %v1010_v24 = vpack.c.bf16 %v657_v20, %v657_v20  ;;  %v1026_v25 = vpack.c.bf16 %v673_v21, %v673_v21  ;;  %v544_v26 = vadd.f32 %v1254_v47, %v543_v22  ;;  %v608_v27 = vadd.f32 %v1254_v47, %v607_v23 }
 0x106   : > { %v545_v28 = vpop.f32.mrf.mxu0  ;;  %v609_v29 = vpop.f32.mrf.mxu1 }
 0x107   : > { %818 = vst.msk [vmem:[%s1262_s18 + $0xc] sm:$0xf] %vm814_vm3, %v1010_v24  ;;  %834 = vst.msk [vmem:[%s1262_s18 + $0x4c] sm:$0xf] %vm814_vm3, %v1026_v25  ;;  %v658_v30 = vmax.f32 %v544_v26, 0.0  ;;  %v674_v31 = vmax.f32 %v608_v27, 0.0 }
 0x108   : > { %v546_v32 = vpop.f32.mrf.mxu0  ;;  %v610_v33 = vpop.f32.mrf.mxu1 }
 0x109   : > { %v1011_v34 = vpack.c.bf16 %v658_v30, %v658_v30  ;;  %v1027_v35 = vpack.c.bf16 %v674_v31, %v674_v31  ;;  %v547_v36 = vadd.f32 %v1254_v47, %v546_v32  ;;  %v611_v37 = vadd.f32 %v1254_v47, %v610_v33 }
 0x10a   : > { %v548_v38 = vpop.f32.mrf.mxu0  ;;  %v612_v39 = vpop.f32.mrf.mxu1 }
 0x10b   : > { %819 = vst.msk [vmem:[%s1262_s18 + $0x10] sm:$0xf] %vm814_vm3, %v1011_v34  ;;  %835 = vst.msk [vmem:[%s1262_s18 + $0x50] sm:$0xf] %vm814_vm3, %v1027_v35  ;;  %v659_v40 = vmax.f32 %v547_v36, 0.0  ;;  %v675_v41 = vmax.f32 %v611_v37, 0.0 }
 0x10c   : > { %v551_v42 = vpop.f32.mrf.mxu0  ;;  %v615_v43 = vpop.f32.mrf.mxu1 }
 0x10d   : > { %v1012_v44 = vpack.c.bf16 %v659_v40, %v659_v40  ;;  %v1028_v45 = vpack.c.bf16 %v675_v41, %v675_v41  ;;  %v552_v46 = vadd.f32 %v1254_v47, %v551_v42  ;;  %v616_v48 = vadd.f32 %v1254_v47, %v615_v43 }
 0x10e   : > { %v553_v49 = vpop.f32.mrf.mxu0  ;;  %v617_v50 = vpop.f32.mrf.mxu1 }
 0x10f   : > { %820 = vst.msk [vmem:[%s1262_s18 + $0x14] sm:$0xf] %vm814_vm3, %v1012_v44  ;;  %836 = vst.msk [vmem:[%s1262_s18 + $0x54] sm:$0xf] %vm814_vm3, %v1028_v45  ;;  %v660_v51 = vmax.f32 %v552_v46, 0.0  ;;  %v676_v52 = vmax.f32 %v616_v48, 0.0 }
 0x110   : > { %v554_v53 = vpop.f32.mrf.mxu0  ;;  %v618_v54 = vpop.f32.mrf.mxu1 }
 0x111   : > { %v1013_v55 = vpack.c.bf16 %v660_v51, %v660_v51  ;;  %v1029_v56 = vpack.c.bf16 %v676_v52, %v676_v52  ;;  %v555_v57 = vadd.f32 %v1254_v47, %v554_v53  ;;  %v619_v58 = vadd.f32 %v1254_v47, %v618_v54 }
 0x112   : > { %v556_v59 = vpop.f32.mrf.mxu0  ;;  %v620_v60 = vpop.f32.mrf.mxu1 }
 0x113   : > { %821 = vst.msk [vmem:[%s1262_s18 + $0x18] sm:$0xf] %vm814_vm3, %v1013_v55  ;;  %837 = vst.msk [vmem:[%s1262_s18 + $0x58] sm:$0xf] %vm814_vm3, %v1029_v56  ;;  %v661_v61 = vmax.f32 %v555_v57, 0.0  ;;  %v677_v62 = vmax.f32 %v619_v58, 0.0 }
 0x114   : > { %v559_v63 = vpop.f32.mrf.mxu0  ;;  %v623_v0 = vpop.f32.mrf.mxu1 }
 0x115   : > { %v1014_v1 = vpack.c.bf16 %v661_v61, %v661_v61  ;;  %v1030_v2 = vpack.c.bf16 %v677_v62, %v677_v62  ;;  %v560_v3 = vadd.f32 %v1254_v47, %v559_v63  ;;  %v624_v4 = vadd.f32 %v1254_v47, %v623_v0 }
 0x116   : > { %v561_v5 = vpop.f32.mrf.mxu0  ;;  %v625_v6 = vpop.f32.mrf.mxu1 }
 0x117   : > { %822 = vst.msk [vmem:[%s1262_s18 + $0x1c] sm:$0xf] %vm814_vm3, %v1014_v1  ;;  %838 = vst.msk [vmem:[%s1262_s18 + $0x5c] sm:$0xf] %vm814_vm3, %v1030_v2  ;;  %v662_v7 = vmax.f32 %v560_v3, 0.0  ;;  %v678_v8 = vmax.f32 %v624_v4, 0.0 }
 0x118   : > { %v562_v9 = vpop.f32.mrf.mxu0  ;;  %v626_v10 = vpop.f32.mrf.mxu1 }
 0x119   : > { %v1015_v11 = vpack.c.bf16 %v662_v7, %v662_v7  ;;  %v1031_v12 = vpack.c.bf16 %v678_v8, %v678_v8  ;;  %v563_v13 = vadd.f32 %v1254_v47, %v562_v9  ;;  %v627_v14 = vadd.f32 %v1254_v47, %v626_v10 }
 0x11a   : > { %v564_v15 = vpop.f32.mrf.mxu0  ;;  %v628_v16 = vpop.f32.mrf.mxu1 }
 0x11b   : > { %823 = vst.msk [vmem:[%s1262_s18 + $0x20] sm:$0xf] %vm814_vm3, %v1015_v11  ;;  %839 = vst.msk [vmem:[%s1262_s18 + $0x60] sm:$0xf] %vm814_vm3, %v1031_v12  ;;  %v663_v17 = vmax.f32 %v563_v13, 0.0  ;;  %v679_v18 = vmax.f32 %v627_v14, 0.0 }
 0x11c   : > { %v567_v19 = vpop.f32.mrf.mxu0  ;;  %v631_v20 = vpop.f32.mrf.mxu1 }
 0x11d   : > { %v1016_v21 = vpack.c.bf16 %v663_v17, %v663_v17  ;;  %v1032_v22 = vpack.c.bf16 %v679_v18, %v679_v18  ;;  %v568_v23 = vadd.f32 %v1254_v47, %v567_v19  ;;  %v632_v24 = vadd.f32 %v1254_v47, %v631_v20 }
 0x11e   : > { %v569_v25 = vpop.f32.mrf.mxu0  ;;  %v633_v26 = vpop.f32.mrf.mxu1 }
 0x11f   : > { %824 = vst.msk [vmem:[%s1262_s18 + $0x24] sm:$0xf] %vm814_vm3, %v1016_v21  ;;  %840 = vst.msk [vmem:[%s1262_s18 + $0x64] sm:$0xf] %vm814_vm3, %v1032_v22  ;;  %v664_v27 = vmax.f32 %v568_v23, 0.0  ;;  %v680_v28 = vmax.f32 %v632_v24, 0.0 }
 0x120   : > { %v570_v29 = vpop.f32.mrf.mxu0  ;;  %v634_v30 = vpop.f32.mrf.mxu1 }
 0x121   : > { %v1017_v31 = vpack.c.bf16 %v664_v27, %v664_v27  ;;  %v1033_v32 = vpack.c.bf16 %v680_v28, %v680_v28  ;;  %v571_v33 = vadd.f32 %v1254_v47, %v570_v29  ;;  %v635_v34 = vadd.f32 %v1254_v47, %v634_v30 }
 0x122   : > { %v572_v35 = vpop.f32.mrf.mxu0  ;;  %v636_v36 = vpop.f32.mrf.mxu1 }
 0x123   : > { %825 = vst.msk [vmem:[%s1262_s18 + $0x28] sm:$0xf] %vm814_vm3, %v1017_v31  ;;  %841 = vst.msk [vmem:[%s1262_s18 + $0x68] sm:$0xf] %vm814_vm3, %v1033_v32  ;;  %v665_v37 = vmax.f32 %v571_v33, 0.0  ;;  %v681_v38 = vmax.f32 %v635_v34, 0.0 }
 0x124   : > { %v575_v39 = vpop.f32.mrf.mxu0  ;;  %v639_v40 = vpop.f32.mrf.mxu1 }
 0x125   : > { %v1018_v41 = vpack.c.bf16 %v665_v37, %v665_v37  ;;  %v1034_v42 = vpack.c.bf16 %v681_v38, %v681_v38  ;;  %v576_v43 = vadd.f32 %v1254_v47, %v575_v39  ;;  %v640_v44 = vadd.f32 %v1254_v47, %v639_v40 }
 0x126   : > { %v577_v45 = vpop.f32.mrf.mxu0  ;;  %v641_v46 = vpop.f32.mrf.mxu1 }
 0x127   : > { %826 = vst.msk [vmem:[%s1262_s18 + $0x2c] sm:$0xf] %vm814_vm3, %v1018_v41  ;;  %842 = vst.msk [vmem:[%s1262_s18 + $0x6c] sm:$0xf] %vm814_vm3, %v1034_v42  ;;  %v666_v48 = vmax.f32 %v576_v43, 0.0  ;;  %v682_v49 = vmax.f32 %v640_v44, 0.0 }
 0x128   : > { %v578_v50 = vpop.f32.mrf.mxu0  ;;  %v642_v51 = vpop.f32.mrf.mxu1 }
 0x129   : > { %v1019_v52 = vpack.c.bf16 %v666_v48, %v666_v48  ;;  %v1035_v53 = vpack.c.bf16 %v682_v49, %v682_v49  ;;  %v579_v54 = vadd.f32 %v1254_v47, %v578_v50  ;;  %v643_v55 = vadd.f32 %v1254_v47, %v642_v51 }
 0x12a   : > { %v580_v56 = vpop.f32.mrf.mxu0  ;;  %v644_v57 = vpop.f32.mrf.mxu1 }
 0x12b   : > { %827 = vst.msk [vmem:[%s1262_s18 + $0x30] sm:$0xf] %vm814_vm3, %v1019_v52  ;;  %843 = vst.msk [vmem:[%s1262_s18 + $0x70] sm:$0xf] %vm814_vm3, %v1035_v53  ;;  %v667_v58 = vmax.f32 %v579_v54, 0.0  ;;  %v683_v59 = vmax.f32 %v643_v55, 0.0 }
 0x12c   : > { %v583_v60 = vpop.f32.mrf.mxu0  ;;  %v647_v61 = vpop.f32.mrf.mxu1 }
 0x12d   : > { %v1020_v62 = vpack.c.bf16 %v667_v58, %v667_v58  ;;  %v1036_v63 = vpack.c.bf16 %v683_v59, %v683_v59  ;;  %v584_v0 = vadd.f32 %v1254_v47, %v583_v60  ;;  %v648_v1 = vadd.f32 %v1254_v47, %v647_v61 }
 0x12e   : > { %v585_v2 = vpop.f32.mrf.mxu0  ;;  %v649_v3 = vpop.f32.mrf.mxu1 }
 0x12f   : > { %828 = vst.msk [vmem:[%s1262_s18 + $0x34] sm:$0xf] %vm814_vm3, %v1020_v62  ;;  %844 = vst.msk [vmem:[%s1262_s18 + $0x74] sm:$0xf] %vm814_vm3, %v1036_v63  ;;  %v668_v4 = vmax.f32 %v584_v0, 0.0  ;;  %v684_v5 = vmax.f32 %v648_v1, 0.0 }
 0x130   : > { %v586_v6 = vpop.f32.mrf.mxu0  ;;  %v650_v7 = vpop.f32.mrf.mxu1 }
 0x131   : > { %v1021_v8 = vpack.c.bf16 %v668_v4, %v668_v4  ;;  %v1037_v9 = vpack.c.bf16 %v684_v5, %v684_v5  ;;  %v587_v10 = vadd.f32 %v1254_v47, %v586_v6  ;;  %v651_v11 = vadd.f32 %v1254_v47, %v650_v7 }
 0x132   : > { %v588_v12 = vpop.f32.mrf.mxu0  ;;  %v652_v13 = vpop.f32.mrf.mxu1 }
 0x133   : > { %829 = vst.msk [vmem:[%s1262_s18 + $0x38] sm:$0xf] %vm814_vm3, %v1021_v8  ;;  %845 = vst.msk [vmem:[%s1262_s18 + $0x78] sm:$0xf] %vm814_vm3, %v1037_v9  ;;  %v669_v14 = vmax.f32 %v587_v10, 0.0  ;;  %v685_v15 = vmax.f32 %v651_v11, 0.0 }
 0x135   : > { %v1022_v16 = vpack.c.bf16 %v669_v14, %v669_v14  ;;  %v1038_v17 = vpack.c.bf16 %v685_v15, %v685_v15 }
 0x137   : > { %830 = vst.msk [vmem:[%s1262_s18 + $0x3c] sm:$0xf] %vm814_vm3, %v1022_v16  ;;  %846 = vst.msk [vmem:[%s1262_s18 + $0x7c] sm:$0xf] %vm814_vm3, %v1038_v17 }
 0x138 PF: > { %s13_s12 = sadd.s32 1, %s1133_s12  }
 0x139   : > { %p10_p4 = scmp.ge.s32.totalorder %s13_s12, 4  }
 0x13b   :  { %12 = sbr.rel (!%p10_p4) target bundleno = 1 (0x1), region = 62 }

</bundles_post_ra>
